<compile_context>
chip_gen: v7x
topology: tpu7x:2x2x1
jax: 0.10.0
libtpu: 0.0.40
codegen_flags: <defaults>
</compile_context>

<pallas_src>
import functools

import jax
import jax.numpy as jnp
from jax.experimental import pallas as pl
from jax.experimental.pallas import tpu as pltpu


def _normalize_kernel(rows_per_block, resident, x_ref, scale_ref, bias_ref, o_ref):
    if resident:
        # scale/bias are resident full-(R_pad,1) columns; slice this block's rows.
        r0 = pl.multiple_of(pl.program_id(0) * rows_per_block, 8)
        scale = scale_ref[pl.ds(r0, rows_per_block), :]
        bias = bias_ref[pl.ds(r0, rows_per_block), :]
    else:
        # Streamed dense (rows, 128) blocks; take one lane, broadcast across x.
        scale = scale_ref[:, 0:1]
        bias = bias_ref[:, 0:1]
    x = x_ref[...].astype(jnp.float32)
    o_ref[...] = (x * scale + bias).astype(o_ref.dtype)


def _chip_policy():
    """(target_block_bytes, vmem_limit_bytes or None, tensorcores_per_chip)."""
    kind = ""
    try:
        kind = jax.devices()[0].device_kind.lower()
    except Exception:
        pass
    if "v7" in kind or "7x" in kind:
        # ~3.2 TB/s HBM, 64 MiB physical VMEM, 2 TensorCores: bigger slabs,
        # raise the scoped limit (4 double-buffered slabs + scale/bias < 48 MiB).
        return 8 * 1024 * 1024, 48 * 1024 * 1024, 2
    if "v6" in kind:
        # 32 MiB scoped default; 2-4 MiB is already at the roofline knee.
        return 4 * 1024 * 1024, None, 1
    # v5e / v5p / unknown: 16 MiB scoped default -> stay at 2 MiB blocks.
    return 2 * 1024 * 1024, None, 1


def normalize(x, mean, std, *, target_block_bytes=None):
    """(x - mean[c]) / std[c] over NCHW input `x`, as a fused x*scale + bias."""
    N, C, H, W = x.shape
    block_bytes, vmem_limit, cores = _chip_policy()
    if target_block_bytes is not None:
        block_bytes = int(target_block_bytes)

    # Float output (PyTorch sub/div with float stats promotes int images).
    out_dtype = x.dtype if jnp.issubdtype(x.dtype, jnp.floating) else jnp.float32

    # Fold statistics into scale/bias, kept in f32.
    mean_f32 = jnp.asarray(mean, jnp.float32).reshape(-1)
    std_f32 = jnp.asarray(std, jnp.float32).reshape(-1)
    scale_c = 1.0 / std_f32            # (C,)
    bias_c = -mean_f32 * scale_c       # (C,)

    # Lane-dense flattening: prefer lanes = H*W; use lanes = W when that
    # recovers a multiple-of-128 lane extent (unmasked stores, contiguous DMA).
    if (H * W) % 128 != 0 and W % 128 == 0:
        rep, L2 = H, W                 # rows = (n, c, h), lanes = W
    else:
        rep, L2 = 1, H * W             # rows = (n, c),    lanes = H*W
    R2 = N * C * rep
    x2 = x.reshape(R2, L2)

    cdiv = lambda a, b: (a + b - 1) // b
    itemsize = max(jnp.dtype(x.dtype).itemsize, jnp.dtype(out_dtype).itemsize)

    # --- Lane tiling guard: huge spatial extents get their own grid axis so a
    # block never exceeds the VMEM budget on any generation.
    if 8 * L2 * itemsize > block_bytes:
        lanes_per_block = max(128, (block_bytes // (8 * itemsize)) // 128 * 128)
        if lanes_per_block >= L2:
            lanes_per_block = L2
    else:
        lanes_per_block = L2
    lane_blocks = cdiv(L2, lanes_per_block)

    # --- Row tiling: biggest slab (multiple of 8 rows) within the block budget.
    rows_per_block = max(8, (block_bytes // max(lanes_per_block * itemsize, 1)) // 8 * 8)
    if rows_per_block >= R2:
        if cores > 1 and R2 > 8:
            # Split small inputs across both v7x TensorCores.
            rows_per_block = (((R2 + 1) // 2) + 7) // 8 * 8
        else:
            rows_per_block = R2        # single block (1-TC chips / tiny inputs)
    row_blocks = cdiv(R2, rows_per_block)
    if cores > 1 and row_blocks > 1 and row_blocks % cores != 0:
        # Megacore balance: make the number of row blocks a multiple of the
        # core count with near-equal sizes.
        nb = cdiv(row_blocks, cores) * cores
        rows_per_block = max(8, (cdiv(R2, nb) + 7) // 8 * 8)
        row_blocks = cdiv(R2, rows_per_block)
    if (cores > 1 and row_blocks == 1 and lane_blocks == 1
            and L2 >= 256 and L2 % 256 == 0):
        # Tiny-row inputs on 2-core chips: split lanes so both cores get work.
        lanes_per_block = L2 // 2
        lane_blocks = 2

    grid = (row_blocks, lane_blocks)

    # --- Per-row scale/bias, hoisted OUT of the per-step pipeline.
    R_pad = row_blocks * rows_per_block
    scale_rows = jnp.tile(jnp.repeat(scale_c, rep), N)   # (R2,)
    bias_rows = jnp.tile(jnp.repeat(bias_c, rep), N)     # (R2,)
    if R_pad > R2:
        scale_rows = jnp.pad(scale_rows, (0, R_pad - R2))
        bias_rows = jnp.pad(bias_rows, (0, R_pad - R2))

    # Resident (R_pad, 1) columns: fetched once (constant block index), sliced
    # in-kernel. Fallback for huge N*C: dense streamed (rows, 128) blocks so
    # the per-step DMA is contiguous instead of a narrow strided scatter.
    resident = R_pad * 128 * 4 <= 2 * 1024 * 1024
    if resident:
        scale_arr = scale_rows.reshape(R_pad, 1)
        bias_arr = bias_rows.reshape(R_pad, 1)
        sb_spec = pl.BlockSpec((R_pad, 1), lambda i, j: (0, 0))
    else:
        scale_arr = jnp.broadcast_to(scale_rows.reshape(R_pad, 1), (R_pad, 128))
        bias_arr = jnp.broadcast_to(bias_rows.reshape(R_pad, 1), (R_pad, 128))
        sb_spec = pl.BlockSpec((rows_per_block, 128), lambda i, j: (i, 0))

    kernel = functools.partial(_normalize_kernel, rows_per_block, resident)

    cp_kwargs = dict(dimension_semantics=("parallel", "parallel"))
    if vmem_limit is not None:
        cp_kwargs["vmem_limit_bytes"] = vmem_limit

    out2 = pl.pallas_call(
        kernel,
        out_shape=jax.ShapeDtypeStruct((R2, L2), out_dtype),
        grid=grid,
        in_specs=[
            pl.BlockSpec((rows_per_block, lanes_per_block), lambda i, j: (i, j)),
            sb_spec,   # scale
            sb_spec,   # bias
        ],
        out_specs=pl.BlockSpec((rows_per_block, lanes_per_block), lambda i, j: (i, j)),
        compiler_params=pltpu.CompilerParams(**cp_kwargs),
    )(x2, scale_arr, bias_arr)

    return out2.reshape(N, C, H, W)


if __name__ == "__main__":
    key = jax.random.PRNGKey(0)
    N, C, H, W = 2, 4, 16, 16

    x = jax.random.normal(key, (N, C, H, W), dtype=jnp.float32)
    # Deterministic per-channel statistics (module buffers).
    mean = jnp.array([0.485, 0.456, 0.406, 0.5], dtype=jnp.float32)
    std = jnp.array([0.229, 0.224, 0.225, 0.25], dtype=jnp.float32)

    out = normalize(x, mean, std)
    jax.block_until_ready(out)

    # Pure-JAX reference (same semantics as normalize_fn). Slightly relaxed
    # tolerance: x*(1/std) + bias differs from (x-mean)/std by ~1 ulp.
    ref = (x - mean[None, :, None, None]) / std[None, :, None, None]
    assert out.shape == (N, C, H, W)
    assert out.dtype == ref.dtype
    assert jnp.allclose(out, ref, atol=1e-5, rtol=1e-5), float(
        jnp.max(jnp.abs(out - ref)))

    print("KERNEL_OK")
</pallas_src>

<mosaic_0001>
module attributes {stable_mosaic.version = 11 : i64} {
  func.func @_normalize_kernel(%arg0: i32, %arg1: i32, %arg2: memref<8x256xf32, #tpu.memory_space<vmem>>, %arg3: memref<8x1xf32, #tpu.memory_space<vmem>>, %arg4: memref<8x1xf32, #tpu.memory_space<vmem>>, %arg5: memref<8x256xf32, #tpu.memory_space<vmem>>) attributes {dimension_semantics = [#tpu.dimension_semantics<parallel>, #tpu.dimension_semantics<parallel>], iteration_bounds = array<i64: 1, 1>, scalar_prefetch = 0 : i64, scratch_operands = 0 : i64, tpu.core_type = #tpu.core_type<tc>, window_params = [{transform_indices = @transform_0, window_bounds = array<i64: 8, 256>}, {pipeline_mode = #tpu.pipeline_mode<synchronous>, transform_indices = @transform_1, window_bounds = array<i64: 8, 1>}, {pipeline_mode = #tpu.pipeline_mode<synchronous>, transform_indices = @transform_2, window_bounds = array<i64: 8, 1>}, {transform_indices = @transform_3, window_bounds = array<i64: 8, 256>}]} {
    %c8_i32 = arith.constant 8 : i32
    %0 = arith.muli %arg0, %c8_i32 : i32
    %1 = tpu.assume_multiple %0, 8 : i32
    %2 = arith.index_cast %1 : i32 to index
    %c0 = arith.constant 0 : index
    %3 = vector.load %arg3[%2, %c0] : memref<8x1xf32, #tpu.memory_space<vmem>>, vector<8x1xf32>
    %4 = arith.index_cast %1 : i32 to index
    %c0_0 = arith.constant 0 : index
    %5 = vector.load %arg4[%4, %c0_0] : memref<8x1xf32, #tpu.memory_space<vmem>>, vector<8x1xf32>
    %c0_1 = arith.constant 0 : index
    %c0_2 = arith.constant 0 : index
    %6 = vector.load %arg2[%c0_1, %c0_2] : memref<8x256xf32, #tpu.memory_space<vmem>>, vector<8x256xf32>
    %7 = vector.broadcast %3 : vector<8x1xf32> to vector<8x256xf32>
    %8 = arith.mulf %6, %7 : vector<8x256xf32>
    %9 = vector.broadcast %5 : vector<8x1xf32> to vector<8x256xf32>
    %10 = arith.addf %8, %9 : vector<8x256xf32>
    %c0_3 = arith.constant 0 : index
    %c0_4 = arith.constant 0 : index
    %11 = vector.load %arg5[%c0_3, %c0_4] : memref<8x256xf32, #tpu.memory_space<vmem>>, vector<8x256xf32>
    tpu.vector_store %arg5[%c0_3, %c0_4], %10 {strides = array<i32>} : memref<8x256xf32, #tpu.memory_space<vmem>>, vector<8x256xf32>,
    return
  }
  func.func @transform_0(%arg0: i32, %arg1: i32) -> (i32, i32) {
    %c0_i32 = arith.constant 0 : i32
    return %arg0, %arg1 : i32, i32
  }
  func.func @transform_1(%arg0: i32, %arg1: i32) -> (i32, i32) {
    %c0_i32 = arith.constant 0 : i32
    %c0_i32_0 = arith.constant 0 : i32
    %c0_i32_1 = arith.constant 0 : i32
    return %c0_i32, %c0_i32_0 : i32, i32
  }
  func.func @transform_2(%arg0: i32, %arg1: i32) -> (i32, i32) {
    %c0_i32 = arith.constant 0 : i32
    %c0_i32_0 = arith.constant 0 : i32
    %c0_i32_1 = arith.constant 0 : i32
    return %c0_i32, %c0_i32_0 : i32, i32
  }
  func.func @transform_3(%arg0: i32, %arg1: i32) -> (i32, i32) {
    %c0_i32 = arith.constant 0 : i32
    return %arg0, %arg1 : i32, i32
  }
}

</mosaic_0001>

<bundles_post_ra>
// kernel: tpu_custom_call.1
= control target key start
LH: loop header
LB: loop body
LE: loop exit
PB: predicated region body
PF: predicated region fallthrough
CT: control target
= control target key end

     0   :  { %v79_v1 = vmov 0   ;;  %s125_s0 = inlined_call_operand.vmem [shape: f32[8,256], index: 0, kind: input, shape index: {}]   ;;  %s126_s1 = inlined_call_operand.vmem [shape: f32[8,1], index: 1, kind: input, shape index: {}]   ;;  %s127_s2 = inlined_call_operand.vmem [shape: f32[8,1], index: 2, kind: input, shape index: {}]   ;;  %s128_s3 = inlined_call_operand.hbm [shape: f32[8,256], index: 3, kind: output, shape index: {}]  }
   0x1   :  { %v17_v0 = vld [vmem:[%s126_s1] sm:$0xff]  ;;  %54 = vset.pattern.permute.xlu0 %v79_v1 }
   0x2   :  { %8 = vsyncpa [#allocation3], 0  ;;  %24 = vperm.xlu0 %54, %v17_v0   ;;  %v19_v2 = vld [vmem:[%s127_s2] sm:$0xff]  ;;  %v21_v4 = vld [vmem:[%s125_s0 + $0x8] sm:$0xff]  ;;  %s80_s20 = smov [#allocation2]  }
   0x3   :  { %v20_v3 = vld [vmem:[%s125_s0] sm:$0xff]  ;;  %s44_s1 = sshll.u32 %s80_s20, 4  ;;  %s45_s1 = int_to_ptr.vmem [resolvable:$true] %s44_s1 }
   0x4   :  { %s55_s2 = scalar_lea.vmem %s45_s1, 256  ;;  %p60_p1 = scmp.lt.s32.totalorder %s45_s1, %s45_s1 }
   0x5   :  { %p56_p0 = scmp.ne.s32.totalorder %s45_s1, %s55_s2  ;;  %p61_p2 = scmp.lt.s32.totalorder %s55_s2, %s55_s2 }
   0x6   :  { %31 = vperm.xlu0 %54, %v19_v2  }
   0x7   :  { %p62_p3 = por %p61_p2, %p60_p1 }
   0x9   :  { %p63_p4 = pnand %p62_p3, %p56_p0 }
  0x81   :  { %v25_v5 = vpop.permute.xlu0 %24 }
  0x82   :  { %v27_v6 = vmul.f32 %v25_v5, %v20_v3  ;;  %v28_v7 = vmul.f32 %v25_v5, %v21_v4 }
  0x85   :  { %v32_v8 = vpop.permute.xlu0 %31 }
  0x86   :  { %v34_v9 = vadd.f32 %v32_v8, %v27_v6  ;;  %v35_v10 = vadd.f32 %v32_v8, %v28_v7 }
  0x88   :  { %36 = vst [vmem:[#allocation2] sm:$0xff] %v34_v9  ;;  %37 = vst [vmem:[#allocation2 + $0x8] sm:$0xff] %v35_v10 }
  0x89   :  { %66 = shalt.err (!%p63_p4)
}
  0x8a   :  { %s67_s22 = scalar_lea.hbm %s128_s3, 256 }
  0x8b   :  { %p68_p5 = scmp.ne.s32.totalorder %s128_s3, %s67_s22  ;;  %p71_p6 = scmp.lt.u32.totalorder %s67_s22, %s128_s3 }
  0x8d   :  { %p73_p7 = pnand %p71_p6, %p68_p5 }
  0x8f   :  { %76 = shalt.err (!%p73_p7)
}
  0x90   :  { %47 = dma.vmem_to_hbm [thread:$0]  %s45_s1, 256, %s128_s3, [#allocation3]  }
  0x91   :  { %77 = dma.done.wait [#allocation3], 256  }
  0x92   :  { %78 = vsyncadd [#allocation3], 4294967040 }
  0x93   :  { %51 = vsyncpa [#allocation3], 1 }

</bundles_post_ra>
